<compile_context>
chip_gen: v6e
topology: v6e:2x2x1
jax: 0.10.0
libtpu: 0.0.40
codegen_flags: <defaults>
</compile_context>

<pallas_src>
import jax
import jax.numpy as jnp
from jax.experimental import pallas as pl
from jax.experimental.pallas import tpu as pltpu


def _round_up(x, m):
    return (x + m - 1) // m * m


def _frozen_bn_kernel(x_ref, ss_ref, o_ref):
    # x_ref: (tile_rows, tile_hw); ss_ref: (tile_rows, 2) f32 [scale, shift].
    ss = ss_ref[...]
    scale = ss[:, 0:1]
    shift = ss[:, 1:2]
    x = x_ref[...].astype(jnp.float32)
    o_ref[...] = (x * scale + shift).astype(o_ref.dtype)


def frozen_batch_norm_2d(x, weight, bias, running_mean, running_var, eps=1e-5):
    """x: (N, C, H, W). weight/bias/running_mean/running_var: (C,)."""
    N, C, H, W = x.shape
    rows, HW = N * C, H * W
    itemsize = x.dtype.itemsize
    # Sublane multiple for packed dtypes: 8 (f32), 16 (bf16), 32 (int8/fp8).
    sub = 8 * max(1, 4 // itemsize)

    TARGET_BLOCK_BYTES = 8 * 1024 * 1024  # ~8 MiB x block (≈16 MiB moved/step)

    # ---- lane (HW) tiling: prefer full 128-padded width when a sub-height
    # row group fits the block budget; otherwise cap so one block ≈ budget.
    hw_p = _round_up(HW, 128)
    max_lanes = max(128, (TARGET_BLOCK_BYTES // (sub * itemsize)) // 128 * 128)
    tile_hw = min(hw_p, max_lanes)

    # ---- row (N*C) tiling: fill the block budget at the chosen lane width.
    row_target = max(sub, (TARGET_BLOCK_BYTES // (tile_hw * itemsize)) // sub * sub)
    tile_rows = min(_round_up(rows, sub), row_target)

    grid = (pl.cdiv(rows, tile_rows), pl.cdiv(HW, tile_hw))

    # ---- fold frozen statistics into a per-channel affine (O(C) glue, f32),
    # packed as one (rows, 2) array: column 0 = scale, column 1 = shift.
    scale = weight.astype(jnp.float32) * jax.lax.rsqrt(
        running_var.astype(jnp.float32) + eps)
    shift = bias.astype(jnp.float32) - running_mean.astype(jnp.float32) * scale
    ss = jnp.stack([jnp.tile(scale, N), jnp.tile(shift, N)], axis=-1)  # (rows, 2)

    x2d = x.reshape(rows, HW)

    out2d = pl.pallas_call(
        _frozen_bn_kernel,
        out_shape=jax.ShapeDtypeStruct((rows, HW), x.dtype),
        grid_spec=pltpu.PrefetchScalarGridSpec(
            num_scalar_prefetch=0,
            grid=grid,
            in_specs=[
                pl.BlockSpec((tile_rows, tile_hw), lambda i, j: (i, j)),
                # Tiny per-row [scale, shift] columns; the block index only
                # changes with the row block (outer axis), so they are not
                # re-DMA'd across the inner lane-block loop.
                pl.BlockSpec((tile_rows, 2), lambda i, j: (i, 0)),
            ],
            out_specs=pl.BlockSpec((tile_rows, tile_hw), lambda i, j: (i, j)),
        ),
        compiler_params=pltpu.CompilerParams(
            # Row axis sharded across TCs on v7x; lane axis kept sequential so
            # each core streams contiguous rows and reuses its scale/shift.
            dimension_semantics=("parallel", "arbitrary"),
            vmem_limit_bytes=48 * 1024 * 1024,
        ),
        cost_estimate=pl.CostEstimate(
            flops=2 * rows * HW,
            transcendentals=0,
            bytes_accessed=2 * rows * HW * itemsize + rows * 2 * 4,
        ),
    )(x2d, ss)

    return out2d.reshape(N, C, H, W)


if __name__ == "__main__":
    key = jax.random.PRNGKey(0)
    N, C, H, W = 2, 4, 16, 16

    kx, kw, kb, km, kv = jax.random.split(key, 5)
    x = jax.random.normal(kx, (N, C, H, W), dtype=jnp.float32)

    # Deterministic "frozen" parameters (module init: ones/zeros, perturbed so
    # the test is non-trivial).
    weight = jnp.ones((C,), jnp.float32) + 0.1 * jax.random.normal(kw, (C,))
    bias = jnp.zeros((C,), jnp.float32) + 0.1 * jax.random.normal(kb, (C,))
    running_mean = jnp.zeros((C,), jnp.float32) + 0.1 * jax.random.normal(km, (C,))
    running_var = jnp.ones((C,), jnp.float32) + 0.1 * jnp.abs(
        jax.random.normal(kv, (C,)))

    out = frozen_batch_norm_2d(x, weight, bias, running_mean, running_var)
    out = jax.block_until_ready(out)

    # Pure-JAX reference (mirrors the PyTorch forward exactly).
    eps = 1e-5
    w4 = weight.reshape(1, -1, 1, 1)
    b4 = bias.reshape(1, -1, 1, 1)
    rv4 = running_var.reshape(1, -1, 1, 1)
    rm4 = running_mean.reshape(1, -1, 1, 1)
    scale_ref = w4 * jax.lax.rsqrt(rv4 + eps)
    shift_ref = b4 - rm4 * scale_ref
    ref = x * scale_ref + shift_ref

    assert out.shape == (N, C, H, W)
    assert out.dtype == x.dtype
    assert jnp.allclose(out, ref, atol=1e-5, rtol=1e-5)

    print("KERNEL_OK")
</pallas_src>

<mosaic_0001>
module attributes {stable_mosaic.version = 11 : i64} {
  func.func @_frozen_bn_kernel(%arg0: i32, %arg1: i32, %arg2: memref<8x256xf32, #tpu.memory_space<vmem>>, %arg3: memref<8x2xf32, #tpu.memory_space<vmem>>, %arg4: memref<8x256xf32, #tpu.memory_space<vmem>>) attributes {dimension_semantics = [#tpu.dimension_semantics<parallel>, #tpu.dimension_semantics<arbitrary>], iteration_bounds = array<i64: 1, 1>, scalar_prefetch = 0 : i64, scratch_operands = 0 : i64, tpu.core_type = #tpu.core_type<tc>, window_params = [{transform_indices = @transform_0, window_bounds = array<i64: 8, 256>}, {transform_indices = @transform_1, window_bounds = array<i64: 8, 2>}, {transform_indices = @transform_2, window_bounds = array<i64: 8, 256>}]} {
    %c0 = arith.constant 0 : index
    %c0_0 = arith.constant 0 : index
    %0 = vector.load %arg3[%c0, %c0_0] : memref<8x2xf32, #tpu.memory_space<vmem>>, vector<8x2xf32>
    %1 = vector.extract_strided_slice %0 {offsets = [0, 0], sizes = [8, 1], strides = [1, 1]} : vector<8x2xf32> to vector<8x1xf32>
    %2 = vector.extract_strided_slice %0 {offsets = [0, 1], sizes = [8, 1], strides = [1, 1]} : vector<8x2xf32> to vector<8x1xf32>
    %c0_1 = arith.constant 0 : index
    %c0_2 = arith.constant 0 : index
    %3 = vector.load %arg2[%c0_1, %c0_2] : memref<8x256xf32, #tpu.memory_space<vmem>>, vector<8x256xf32>
    %4 = vector.broadcast %1 : vector<8x1xf32> to vector<8x256xf32>
    %5 = arith.mulf %3, %4 : vector<8x256xf32>
    %6 = vector.broadcast %2 : vector<8x1xf32> to vector<8x256xf32>
    %7 = arith.addf %5, %6 : vector<8x256xf32>
    %c0_3 = arith.constant 0 : index
    %c0_4 = arith.constant 0 : index
    %8 = vector.load %arg4[%c0_3, %c0_4] : memref<8x256xf32, #tpu.memory_space<vmem>>, vector<8x256xf32>
    tpu.vector_store %arg4[%c0_3, %c0_4], %7 {strides = array<i32>} : memref<8x256xf32, #tpu.memory_space<vmem>>, vector<8x256xf32>,
    return
  }
  func.func @transform_0(%arg0: i32, %arg1: i32) -> (i32, i32) {
    %c0_i32 = arith.constant 0 : i32
    return %arg0, %arg1 : i32, i32
  }
  func.func @transform_1(%arg0: i32, %arg1: i32) -> (i32, i32) {
    %c0_i32 = arith.constant 0 : i32
    %c0_i32_0 = arith.constant 0 : i32
    return %arg0, %c0_i32 : i32, i32
  }
  func.func @transform_2(%arg0: i32, %arg1: i32) -> (i32, i32) {
    %c0_i32 = arith.constant 0 : i32
    return %arg0, %arg1 : i32, i32
  }
}

</mosaic_0001>

<bundles_post_ra>
// kernel: tpu_custom_call.1
= control target key start
LH: loop header
LB: loop body
LE: loop exit
PB: predicated region body
PF: predicated region fallthrough
CT: control target
= control target key end

     0   :  { %7 = vsyncpa [#allocation3], 0  ;;  %s135_s0 = inlined_call_operand.hbm [shape: f32[8,256], index: 0, kind: input, shape index: {}]   ;;  %s136_s1 = inlined_call_operand.vmem [shape: f32[8,2], index: 1, kind: input, shape index: {}]   ;;  %s137_s2 = inlined_call_operand.hbm [shape: f32[8,256], index: 2, kind: output, shape index: {}]  }
   0x1   :  { %8 = vsyncpa [#allocation4], 0  ;;  %s107_s9 = smov [#allocation2]  }
   0x2   :  { %s15_s10 = sshll.u32 %s107_s9, 4  ;;  %s16_s10 = int_to_ptr.vmem [resolvable:$true] %s15_s10 }
   0x3   :  { %s71_s11 = scalar_lea.vmem %s16_s10, 256  ;;  %p76_p1 = scmp.lt.s32.totalorder %s16_s10, %s16_s10 }
   0x4   :  { %p72_p0 = scmp.ne.s32.totalorder %s16_s10, %s71_s11  ;;  %p77_p2 = scmp.lt.s32.totalorder %s71_s11, %s71_s11 }
   0x6   :  { %p78_p3 = por %p77_p2, %p76_p1 }
   0x8   :  { %p79_p4 = pnand %p78_p3, %p72_p0 }
   0xa   :  { %82 = shalt.err (!%p79_p4)
}
   0xb   :  { %18 = dma.hbm_to_vmem [thread:$0]  %s135_s0, 256, %s16_s10, [#allocation3]  }
   0xc   :  { %103 = dma.done.wait [#allocation3], 256  }
   0xd   :  { %104 = vsyncadd [#allocation3], 4294967040  ;;  %v108_v0 = vmov 0   ;;  %v24_v1 = vld [vmem:[%s136_s1] sm:$0xff]  ;;  %v109_v2 = vmov 1   ;;  %v26_v5 = vld [vmem:[#allocation2 + $0x8] sm:$0xff] }
   0xe   :  { %61 = vset.pattern.permute.xlu0 %v108_v0  ;;  %v25_v4 = vld [vmem:[#allocation2] sm:$0xff]  ;;  %s110_s16 = smov [#allocation5]  }
   0xf   :  { %29 = vperm.xlu0 %61, %v24_v1   ;;  %s48_s17 = sshll.u32 %s110_s16, 4  ;;  %s49_s17 = int_to_ptr.vmem [resolvable:$true] %s48_s17 }
  0x10   :  { %s83_s0 = scalar_lea.vmem %s49_s17, 256  ;;  %p88_p6 = scmp.lt.s32.totalorder %s49_s17, %s49_s17 }
  0x11   :  { %p84_p5 = scmp.ne.s32.totalorder %s49_s17, %s83_s0  ;;  %p89_p7 = scmp.lt.s32.totalorder %s83_s0, %s83_s0 }
  0x13   :  { %62 = vset.pattern.permute.xlu0 %v109_v2  ;;  %p90_p8 = por %p89_p7, %p88_p6 }
  0x14   :  { %35 = vperm.xlu0 %62, %v24_v1  }
  0x15   :  { %p91_p9 = pnand %p90_p8, %p84_p5 }
  0x8a   :  { %v30_v3 = vpop.permute.xlu0 %29 }
  0x8b   :  { %v32_v6 = vmul.f32 %v30_v3, %v25_v4  ;;  %v33_v7 = vmul.f32 %v30_v3, %v26_v5 }
  0x8f   :  { %v36_v8 = vpop.permute.xlu0 %35 }
  0x90   :  { %v38_v9 = vadd.f32 %v36_v8, %v32_v6  ;;  %v39_v10 = vadd.f32 %v36_v8, %v33_v7 }
  0x92   :  { %40 = vst [vmem:[#allocation5] sm:$0xff] %v38_v9  ;;  %41 = vst [vmem:[#allocation5 + $0x8] sm:$0xff] %v39_v10 }
  0x93   :  { %94 = shalt.err (!%p91_p9)
}
  0x94   :  { %51 = dma.vmem_to_hbm [thread:$0]  %s49_s17, 256, %s137_s2, [#allocation4]  }
  0x95   :  { %105 = dma.done.wait [#allocation4], 256  }
  0x96   :  { %106 = vsyncadd [#allocation4], 4294967040 }
  0x97   :  { %55 = vsyncpa [#allocation3], 1 }
  0x98   :  { %56 = vsyncpa [#allocation4], 1 }

</bundles_post_ra>
